<compile_context>
chip_gen: v7x
topology: tpu7x:2x2x1
jax: 0.10.0
libtpu: 0.0.40
codegen_flags: <defaults>
</compile_context>

<pallas_src>
import functools

import jax
import jax.numpy as jnp
from jax.experimental import pallas as pl
from jax.experimental.pallas import tpu as pltpu


@functools.partial(jax.jit, static_argnames=("kernel_size",))
def complex_conv2d(x_r, x_i, w_r, b_r, w_i, b_i, kernel_size=3):
    """Pallas TPU implementation of ComplexConv2d.forward
    (stride=1, padding=0, dilation=1, groups=1).  NCHW float32 in/out."""
    N, C, H, W = x_r.shape
    O = w_r.shape[0]
    kh = kw = kernel_size
    OH, OW = H - kh + 1, W - kw + 1
    HW = H * W
    # Flat output length using INPUT row stride W: p = oh*W + ow.  The last
    # valid tap index is exactly H*W - 1, so no input padding is required.
    L = (OH - 1) * W + OW

    # Free reshapes (contiguous minor-dim merge -> no HBM copy).
    xr_flat = x_r.reshape(N, C, HW)
    xi_flat = x_i.reshape(N, C, HW)

    # Tiny, VMEM-resident parameters:
    #   out_cat = sum_ij Wp_ij @ xr_tap(i,j) + Wq_ij @ xi_tap(i,j) + b_cat
    #   Wp_ij = [Wr_ij ; Wi_ij],  Wq_ij = [-Wi_ij ; Wr_ij]        (2O, C) each
    wp = jnp.concatenate([w_r, w_i], axis=0)            # (2O, C, kh, kw)
    wq = jnp.concatenate([-w_i, w_r], axis=0)            # (2O, C, kh, kw)
    wp = wp.transpose(2, 3, 0, 1).reshape(kh * kw, 2 * O, C).astype(jnp.float32)
    wq = wq.transpose(2, 3, 0, 1).reshape(kh * kw, 2 * O, C).astype(jnp.float32)
    b_cat = jnp.concatenate([b_r - b_i, b_r + b_i]).reshape(2 * O, 1)
    b_cat = b_cat.astype(jnp.float32)

    def kernel(xr_ref, xi_ref, wp_ref, wq_ref, b_ref, or_ref, oi_ref):
        # xr_ref/xi_ref: (1, C, HW)   wp/wq: (kh*kw, 2O, C)   b: (2O, 1)
        # or_ref/oi_ref: (1, O, L)
        acc = jnp.zeros((2 * O, L), jnp.float32)
        for i in range(kh):                      # short static loops: unrolled
            for j in range(kw):
                t = i * kw + j
                s = i * W + j                    # static lane offset of tap (i,j)
                acc += jnp.dot(wp_ref[t], xr_ref[0, :, s:s + L],
                               preferred_element_type=jnp.float32)
                acc += jnp.dot(wq_ref[t], xi_ref[0, :, s:s + L],
                               preferred_element_type=jnp.float32)
        res = acc + b_ref[...]                   # bias broadcast over lanes
        or_ref[0] = res[:O]                      # real part
        oi_ref[0] = res[O:]                      # imag part

    # Advisory cost: 2 matmuls of (2O, C) x (C, L) per tap per image.
    flops = 2 * (2 * O) * C * L * 2 * kh * kw * N
    bytes_accessed = (2 * N * C * HW * 4          # image reads
                      + 2 * N * O * L * 4         # flat output writes
                      + 2 * kh * kw * 2 * O * C * 4 + 2 * O * 4)
    cost = pl.CostEstimate(flops=flops, transcendentals=0,
                           bytes_accessed=bytes_accessed)

    # VMEM budget: double-buffered image/output blocks + params + accumulator.
    blk_in_bytes = C * HW * 4
    blk_out_bytes = O * L * 4
    est = (2 * 2 * blk_in_bytes + 2 * 2 * blk_out_bytes
           + 2 * (2 * O) * L * 4 + 2 * kh * kw * 2 * O * C * 4 + (1 << 20))
    vmem_limit = int(min(max(est, 32 * 1024 * 1024), 64 * 1024 * 1024))

    out_r_flat, out_i_flat = pl.pallas_call(
        kernel,
        out_shape=(jax.ShapeDtypeStruct((N, O, L), jnp.float32),
                   jax.ShapeDtypeStruct((N, O, L), jnp.float32)),
        grid_spec=pltpu.PrefetchScalarGridSpec(
            num_scalar_prefetch=0,
            grid=(N,),
            in_specs=[
                pl.BlockSpec((1, C, HW), lambda n: (n, 0, 0)),          # x_r image
                pl.BlockSpec((1, C, HW), lambda n: (n, 0, 0)),          # x_i image
                pl.BlockSpec((kh * kw, 2 * O, C), lambda n: (0, 0, 0)),  # Wp (resident)
                pl.BlockSpec((kh * kw, 2 * O, C), lambda n: (0, 0, 0)),  # Wq (resident)
                pl.BlockSpec((2 * O, 1), lambda n: (0, 0)),             # fused bias
            ],
            out_specs=[
                pl.BlockSpec((1, O, L), lambda n: (n, 0, 0)),
                pl.BlockSpec((1, O, L), lambda n: (n, 0, 0)),
            ],
        ),
        compiler_params=pltpu.CompilerParams(
            dimension_semantics=("parallel",),
            vmem_limit_bytes=vmem_limit),
        cost_estimate=cost,
    )(xr_flat, xi_flat, wp, wq, b_cat)

    # Single fused pad/reshape/slice per output: p = oh*W + ow -> (OH, OW),
    # dropping the (W - OW) garbage columns.  No transposes.
    def to_nchw(flat):
        flat = jnp.pad(flat, ((0, 0), (0, 0), (0, OH * W - L)))
        return flat.reshape(N, O, OH, W)[:, :, :, :OW]

    return to_nchw(out_r_flat), to_nchw(out_i_flat)


# ---------------------------------------------------------------------------
# Reference (plain JAX / XLA) for sanity-checking semantics
# ---------------------------------------------------------------------------
def _conv_ref(x, w, b):
    out = jax.lax.conv_general_dilated(
        x, w, window_strides=(1, 1), padding="VALID",
        dimension_numbers=("NCHW", "OIHW", "NCHW"))
    return out + b[None, :, None, None]


if __name__ == "__main__":
    key = jax.random.PRNGKey(0)
    k1, k2, k3, k4, k5, k6 = jax.random.split(key, 6)

    # Small shapes consistent with the module: batch=2, in_ch=4, spatial=16,
    # out_ch=8, kernel_size=3 (stride=1, padding=0 -> 14x14 output).
    N, C_in, H, W = 2, 4, 16, 16
    C_out, ksz = 8, 3

    x_r = jax.random.normal(k1, (N, C_in, H, W), jnp.float32)
    x_i = jax.random.normal(k2, (N, C_in, H, W), jnp.float32)

    # Synthetic parameters (Conv2d shapes: (O, C, kh, kw), (O,)).
    w_r = jax.random.normal(k3, (C_out, C_in, ksz, ksz), jnp.float32) * 0.1
    w_i = jax.random.normal(k4, (C_out, C_in, ksz, ksz), jnp.float32) * 0.1
    b_r = jax.random.normal(k5, (C_out,), jnp.float32) * 0.1
    b_i = jax.random.normal(k6, (C_out,), jnp.float32) * 0.1

    out_r, out_i = complex_conv2d(x_r, x_i, w_r, b_r, w_i, b_i, kernel_size=ksz)
    jax.block_until_ready((out_r, out_i))

    ref_r = _conv_ref(x_r, w_r, b_r) - _conv_ref(x_i, w_i, b_i)
    ref_i = _conv_ref(x_i, w_r, b_r) + _conv_ref(x_r, w_i, b_i)
    assert out_r.shape == (N, C_out, H - ksz + 1, W - ksz + 1)
    assert out_i.shape == (N, C_out, H - ksz + 1, W - ksz + 1)
    assert jnp.allclose(out_r, ref_r, atol=2e-2, rtol=2e-2)
    assert jnp.allclose(out_i, ref_i, atol=2e-2, rtol=2e-2)

    print("KERNEL_OK")
</pallas_src>

<mosaic_0001>
module attributes {stable_mosaic.version = 11 : i64} {
  func.func @kernel(%arg0: i32, %arg1: memref<1x4x256xf32, #tpu.memory_space<vmem>>, %arg2: memref<1x4x256xf32, #tpu.memory_space<vmem>>, %arg3: memref<9x16x4xf32, #tpu.memory_space<vmem>>, %arg4: memref<9x16x4xf32, #tpu.memory_space<vmem>>, %arg5: memref<16x1xf32, #tpu.memory_space<vmem>>, %arg6: memref<1x8x222xf32, #tpu.memory_space<vmem>>, %arg7: memref<1x8x222xf32, #tpu.memory_space<vmem>>) attributes {dimension_semantics = [#tpu.dimension_semantics<parallel>], iteration_bounds = array<i64: 2>, scalar_prefetch = 0 : i64, scratch_operands = 0 : i64, tpu.core_type = #tpu.core_type<tc>, window_params = [{transform_indices = @transform_0, window_bounds = array<i64: 1, 4, 256>}, {transform_indices = @transform_1, window_bounds = array<i64: 1, 4, 256>}, {pipeline_mode = #tpu.pipeline_mode<synchronous>, transform_indices = @transform_2, window_bounds = array<i64: 9, 16, 4>}, {pipeline_mode = #tpu.pipeline_mode<synchronous>, transform_indices = @transform_3, window_bounds = array<i64: 9, 16, 4>}, {pipeline_mode = #tpu.pipeline_mode<synchronous>, transform_indices = @transform_4, window_bounds = array<i64: 16, 1>}, {transform_indices = @transform_5, window_bounds = array<i64: 1, 8, 222>}, {transform_indices = @transform_6, window_bounds = array<i64: 1, 8, 222>}]} {
    %cst = arith.constant 0.000000e+00 : f32
    %0 = vector.broadcast %cst : f32 to vector<16x222xf32>
    %c0 = arith.constant 0 : index
    %c0_0 = arith.constant 0 : index
    %c0_1 = arith.constant 0 : index
    %1 = vector.load %arg3[%c0, %c0_0, %c0_1] : memref<9x16x4xf32, #tpu.memory_space<vmem>>, vector<1x16x4xf32>
    %2 = vector.shape_cast %1 : vector<1x16x4xf32> to vector<16x4xf32>
    %c0_2 = arith.constant 0 : index
    %c0_3 = arith.constant 0 : index
    %c0_4 = arith.constant 0 : index
    %3 = vector.load %arg1[%c0_2, %c0_3, %c0_4] : memref<1x4x256xf32, #tpu.memory_space<vmem>>, vector<1x4x222xf32>
    %4 = vector.shape_cast %3 : vector<1x4x222xf32> to vector<4x222xf32>
    %cst_5 = arith.constant dense<0.000000e+00> : vector<16x222xf32>
    %5 = tpu.matmul %2, %4, %cst_5 {dimension_numbers = #tpu.dot_dimension_numbers<[1], [0], [0], [1], [0, 0, 1, 1], [], []>} : vector<16x4xf32>, vector<4x222xf32>, vector<16x222xf32> -> vector<16x222xf32>
    %6 = arith.addf %0, %5 : vector<16x222xf32>
    %c0_6 = arith.constant 0 : index
    %c0_7 = arith.constant 0 : index
    %c0_8 = arith.constant 0 : index
    %7 = vector.load %arg4[%c0_6, %c0_7, %c0_8] : memref<9x16x4xf32, #tpu.memory_space<vmem>>, vector<1x16x4xf32>
    %8 = vector.shape_cast %7 : vector<1x16x4xf32> to vector<16x4xf32>
    %c0_9 = arith.constant 0 : index
    %c0_10 = arith.constant 0 : index
    %c0_11 = arith.constant 0 : index
    %9 = vector.load %arg2[%c0_9, %c0_10, %c0_11] : memref<1x4x256xf32, #tpu.memory_space<vmem>>, vector<1x4x222xf32>
    %10 = vector.shape_cast %9 : vector<1x4x222xf32> to vector<4x222xf32>
    %cst_12 = arith.constant dense<0.000000e+00> : vector<16x222xf32>
    %11 = tpu.matmul %8, %10, %cst_12 {dimension_numbers = #tpu.dot_dimension_numbers<[1], [0], [0], [1], [0, 0, 1, 1], [], []>} : vector<16x4xf32>, vector<4x222xf32>, vector<16x222xf32> -> vector<16x222xf32>
    %12 = arith.addf %6, %11 : vector<16x222xf32>
    %c1 = arith.constant 1 : index
    %c0_13 = arith.constant 0 : index
    %c0_14 = arith.constant 0 : index
    %13 = vector.load %arg3[%c1, %c0_13, %c0_14] : memref<9x16x4xf32, #tpu.memory_space<vmem>>, vector<1x16x4xf32>
    %14 = vector.shape_cast %13 : vector<1x16x4xf32> to vector<16x4xf32>
    %c0_15 = arith.constant 0 : index
    %c0_16 = arith.constant 0 : index
    %c1_17 = arith.constant 1 : index
    %15 = vector.load %arg1[%c0_15, %c0_16, %c1_17] : memref<1x4x256xf32, #tpu.memory_space<vmem>>, vector<1x4x222xf32>
    %16 = vector.shape_cast %15 : vector<1x4x222xf32> to vector<4x222xf32>
    %cst_18 = arith.constant dense<0.000000e+00> : vector<16x222xf32>
    %17 = tpu.matmul %14, %16, %cst_18 {dimension_numbers = #tpu.dot_dimension_numbers<[1], [0], [0], [1], [0, 0, 1, 1], [], []>} : vector<16x4xf32>, vector<4x222xf32>, vector<16x222xf32> -> vector<16x222xf32>
    %18 = arith.addf %12, %17 : vector<16x222xf32>
    %c1_19 = arith.constant 1 : index
    %c0_20 = arith.constant 0 : index
    %c0_21 = arith.constant 0 : index
    %19 = vector.load %arg4[%c1_19, %c0_20, %c0_21] : memref<9x16x4xf32, #tpu.memory_space<vmem>>, vector<1x16x4xf32>
    %20 = vector.shape_cast %19 : vector<1x16x4xf32> to vector<16x4xf32>
    %c0_22 = arith.constant 0 : index
    %c0_23 = arith.constant 0 : index
    %c1_24 = arith.constant 1 : index
    %21 = vector.load %arg2[%c0_22, %c0_23, %c1_24] : memref<1x4x256xf32, #tpu.memory_space<vmem>>, vector<1x4x222xf32>
    %22 = vector.shape_cast %21 : vector<1x4x222xf32> to vector<4x222xf32>
    %cst_25 = arith.constant dense<0.000000e+00> : vector<16x222xf32>
    %23 = tpu.matmul %20, %22, %cst_25 {dimension_numbers = #tpu.dot_dimension_numbers<[1], [0], [0], [1], [0, 0, 1, 1], [], []>} : vector<16x4xf32>, vector<4x222xf32>, vector<16x222xf32> -> vector<16x222xf32>
    %24 = arith.addf %18, %23 : vector<16x222xf32>
    %c2 = arith.constant 2 : index
    %c0_26 = arith.constant 0 : index
    %c0_27 = arith.constant 0 : index
    %25 = vector.load %arg3[%c2, %c0_26, %c0_27] : memref<9x16x4xf32, #tpu.memory_space<vmem>>, vector<1x16x4xf32>
    %26 = vector.shape_cast %25 : vector<1x16x4xf32> to vector<16x4xf32>
    %c0_28 = arith.constant 0 : index
    %c0_29 = arith.constant 0 : index
    %c2_30 = arith.constant 2 : index
    %27 = vector.load %arg1[%c0_28, %c0_29, %c2_30] : memref<1x4x256xf32, #tpu.memory_space<vmem>>, vector<1x4x222xf32>
    %28 = vector.shape_cast %27 : vector<1x4x222xf32> to vector<4x222xf32>
    %cst_31 = arith.constant dense<0.000000e+00> : vector<16x222xf32>
    %29 = tpu.matmul %26, %28, %cst_31 {dimension_numbers = #tpu.dot_dimension_numbers<[1], [0], [0], [1], [0, 0, 1, 1], [], []>} : vector<16x4xf32>, vector<4x222xf32>, vector<16x222xf32> -> vector<16x222xf32>
    %30 = arith.addf %24, %29 : vector<16x222xf32>
    %c2_32 = arith.constant 2 : index
    %c0_33 = arith.constant 0 : index
    %c0_34 = arith.constant 0 : index
    %31 = vector.load %arg4[%c2_32, %c0_33, %c0_34] : memref<9x16x4xf32, #tpu.memory_space<vmem>>, vector<1x16x4xf32>
    %32 = vector.shape_cast %31 : vector<1x16x4xf32> to vector<16x4xf32>
    %c0_35 = arith.constant 0 : index
    %c0_36 = arith.constant 0 : index
    %c2_37 = arith.constant 2 : index
    %33 = vector.load %arg2[%c0_35, %c0_36, %c2_37] : memref<1x4x256xf32, #tpu.memory_space<vmem>>, vector<1x4x222xf32>
    %34 = vector.shape_cast %33 : vector<1x4x222xf32> to vector<4x222xf32>
    %cst_38 = arith.constant dense<0.000000e+00> : vector<16x222xf32>
    %35 = tpu.matmul %32, %34, %cst_38 {dimension_numbers = #tpu.dot_dimension_numbers<[1], [0], [0], [1], [0, 0, 1, 1], [], []>} : vector<16x4xf32>, vector<4x222xf32>, vector<16x222xf32> -> vector<16x222xf32>
    %36 = arith.addf %30, %35 : vector<16x222xf32>
    %c3 = arith.constant 3 : index
    %c0_39 = arith.constant 0 : index
    %c0_40 = arith.constant 0 : index
    %37 = vector.load %arg3[%c3, %c0_39, %c0_40] : memref<9x16x4xf32, #tpu.memory_space<vmem>>, vector<1x16x4xf32>
    %38 = vector.shape_cast %37 : vector<1x16x4xf32> to vector<16x4xf32>
    %c0_41 = arith.constant 0 : index
    %c0_42 = arith.constant 0 : index
    %c16 = arith.constant 16 : index
    %39 = vector.load %arg1[%c0_41, %c0_42, %c16] : memref<1x4x256xf32, #tpu.memory_space<vmem>>, vector<1x4x222xf32>
    %40 = vector.shape_cast %39 : vector<1x4x222xf32> to vector<4x222xf32>
    %cst_43 = arith.constant dense<0.000000e+00> : vector<16x222xf32>
    %41 = tpu.matmul %38, %40, %cst_43 {dimension_numbers = #tpu.dot_dimension_numbers<[1], [0], [0], [1], [0, 0, 1, 1], [], []>} : vector<16x4xf32>, vector<4x222xf32>, vector<16x222xf32> -> vector<16x222xf32>
    %42 = arith.addf %36, %41 : vector<16x222xf32>
    %c3_44 = arith.constant 3 : index
    %c0_45 = arith.constant 0 : index
    %c0_46 = arith.constant 0 : index
    %43 = vector.load %arg4[%c3_44, %c0_45, %c0_46] : memref<9x16x4xf32, #tpu.memory_space<vmem>>, vector<1x16x4xf32>
    %44 = vector.shape_cast %43 : vector<1x16x4xf32> to vector<16x4xf32>
    %c0_47 = arith.constant 0 : index
    %c0_48 = arith.constant 0 : index
    %c16_49 = arith.constant 16 : index
    %45 = vector.load %arg2[%c0_47, %c0_48, %c16_49] : memref<1x4x256xf32, #tpu.memory_space<vmem>>, vector<1x4x222xf32>
    %46 = vector.shape_cast %45 : vector<1x4x222xf32> to vector<4x222xf32>
    %cst_50 = arith.constant dense<0.000000e+00> : vector<16x222xf32>
    %47 = tpu.matmul %44, %46, %cst_50 {dimension_numbers = #tpu.dot_dimension_numbers<[1], [0], [0], [1], [0, 0, 1, 1], [], []>} : vector<16x4xf32>, vector<4x222xf32>, vector<16x222xf32> -> vector<16x222xf32>
    %48 = arith.addf %42, %47 : vector<16x222xf32>
    %c4 = arith.constant 4 : index
    %c0_51 = arith.constant 0 : index
    %c0_52 = arith.constant 0 : index
    %49 = vector.load %arg3[%c4, %c0_51, %c0_52] : memref<9x16x4xf32, #tpu.memory_space<vmem>>, vector<1x16x4xf32>
    %50 = vector.shape_cast %49 : vector<1x16x4xf32> to vector<16x4xf32>
    %c0_53 = arith.constant 0 : index
    %c0_54 = arith.constant 0 : index
    %c17 = arith.constant 17 : index
    %51 = vector.load %arg1[%c0_53, %c0_54, %c17] : memref<1x4x256xf32, #tpu.memory_space<vmem>>, vector<1x4x222xf32>
    %52 = vector.shape_cast %51 : vector<1x4x222xf32> to vector<4x222xf32>
    %cst_55 = arith.constant dense<0.000000e+00> : vector<16x222xf32>
    %53 = tpu.matmul %50, %52, %cst_55 {dimension_numbers = #tpu.dot_dimension_numbers<[1], [0], [0], [1], [0, 0, 1, 1], [], []>} : vector<16x4xf32>, vector<4x222xf32>, vector<16x222xf32> -> vector<16x222xf32>
    %54 = arith.addf %48, %53 : vector<16x222xf32>
    %c4_56 = arith.constant 4 : index
    %c0_57 = arith.constant 0 : index
    %c0_58 = arith.constant 0 : index
    %55 = vector.load %arg4[%c4_56, %c0_57, %c0_58] : memref<9x16x4xf32, #tpu.memory_space<vmem>>, vector<1x16x4xf32>
    %56 = vector.shape_cast %55 : vector<1x16x4xf32> to vector<16x4xf32>
    %c0_59 = arith.constant 0 : index
    %c0_60 = arith.constant 0 : index
    %c17_61 = arith.constant 17 : index
    %57 = vector.load %arg2[%c0_59, %c0_60, %c17_61] : memref<1x4x256xf32, #tpu.memory_space<vmem>>, vector<1x4x222xf32>
    %58 = vector.shape_cast %57 : vector<1x4x222xf32> to vector<4x222xf32>
    %cst_62 = arith.constant dense<0.000000e+00> : vector<16x222xf32>
    %59 = tpu.matmul %56, %58, %cst_62 {dimension_numbers = #tpu.dot_dimension_numbers<[1], [0], [0], [1], [0, 0, 1, 1], [], []>} : vector<16x4xf32>, vector<4x222xf32>, vector<16x222xf32> -> vector<16x222xf32>
    %60 = arith.addf %54, %59 : vector<16x222xf32>
    %c5 = arith.constant 5 : index
    %c0_63 = arith.constant 0 : index
    %c0_64 = arith.constant 0 : index
    %61 = vector.load %arg3[%c5, %c0_63, %c0_64] : memref<9x16x4xf32, #tpu.memory_space<vmem>>, vector<1x16x4xf32>
    %62 = vector.shape_cast %61 : vector<1x16x4xf32> to vector<16x4xf32>
    %c0_65 = arith.constant 0 : index
    %c0_66 = arith.constant 0 : index
    %c18 = arith.constant 18 : index
    %63 = vector.load %arg1[%c0_65, %c0_66, %c18] : memref<1x4x256xf32, #tpu.memory_space<vmem>>, vector<1x4x222xf32>
    %64 = vector.shape_cast %63 : vector<1x4x222xf32> to vector<4x222xf32>
    %cst_67 = arith.constant dense<0.000000e+00> : vector<16x222xf32>
    %65 = tpu.matmul %62, %64, %cst_67 {dimension_numbers = #tpu.dot_dimension_numbers<[1], [0], [0], [1], [0, 0, 1, 1], [], []>} : vector<16x4xf32>, vector<4x222xf32>, vector<16x222xf32> -> vector<16x222xf32>
    %66 = arith.addf %60, %65 : vector<16x222xf32>
    %c5_68 = arith.constant 5 : index
    %c0_69 = arith.constant 0 : index
    %c0_70 = arith.constant 0 : index
    %67 = vector.load %arg4[%c5_68, %c0_69, %c0_70] : memref<9x16x4xf32, #tpu.memory_space<vmem>>, vector<1x16x4xf32>
    %68 = vector.shape_cast %67 : vector<1x16x4xf32> to vector<16x4xf32>
    %c0_71 = arith.constant 0 : index
    %c0_72 = arith.constant 0 : index
    %c18_73 = arith.constant 18 : index
    %69 = vector.load %arg2[%c0_71, %c0_72, %c18_73] : memref<1x4x256xf32, #tpu.memory_space<vmem>>, vector<1x4x222xf32>
    %70 = vector.shape_cast %69 : vector<1x4x222xf32> to vector<4x222xf32>
    %cst_74 = arith.constant dense<0.000000e+00> : vector<16x222xf32>
    %71 = tpu.matmul %68, %70, %cst_74 {dimension_numbers = #tpu.dot_dimension_numbers<[1], [0], [0], [1], [0, 0, 1, 1], [], []>} : vector<16x4xf32>, vector<4x222xf32>, vector<16x222xf32> -> vector<16x222xf32>
    %72 = arith.addf %66, %71 : vector<16x222xf32>
    %c6 = arith.constant 6 : index
    %c0_75 = arith.constant 0 : index
    %c0_76 = arith.constant 0 : index
    %73 = vector.load %arg3[%c6, %c0_75, %c0_76] : memref<9x16x4xf32, #tpu.memory_space<vmem>>, vector<1x16x4xf32>
    %74 = vector.shape_cast %73 : vector<1x16x4xf32> to vector<16x4xf32>
    %c0_77 = arith.constant 0 : index
    %c0_78 = arith.constant 0 : index
    %c32 = arith.constant 32 : index
    %75 = vector.load %arg1[%c0_77, %c0_78, %c32] : memref<1x4x256xf32, #tpu.memory_space<vmem>>, vector<1x4x222xf32>
    %76 = vector.shape_cast %75 : vector<1x4x222xf32> to vector<4x222xf32>
    %cst_79 = arith.constant dense<0.000000e+00> : vector<16x222xf32>
    %77 = tpu.matmul %74, %76, %cst_79 {dimension_numbers = #tpu.dot_dimension_numbers<[1], [0], [0], [1], [0, 0, 1, 1], [], []>} : vector<16x4xf32>, vector<4x222xf32>, vector<16x222xf32> -> vector<16x222xf32>
    %78 = arith.addf %72, %77 : vector<16x222xf32>
    %c6_80 = arith.constant 6 : index
    %c0_81 = arith.constant 0 : index
    %c0_82 = arith.constant 0 : index
    %79 = vector.load %arg4[%c6_80, %c0_81, %c0_82] : memref<9x16x4xf32, #tpu.memory_space<vmem>>, vector<1x16x4xf32>
    %80 = vector.shape_cast %79 : vector<1x16x4xf32> to vector<16x4xf32>
    %c0_83 = arith.constant 0 : index
    %c0_84 = arith.constant 0 : index
    %c32_85 = arith.constant 32 : index
    %81 = vector.load %arg2[%c0_83, %c0_84, %c32_85] : memref<1x4x256xf32, #tpu.memory_space<vmem>>, vector<1x4x222xf32>
    %82 = vector.shape_cast %81 : vector<1x4x222xf32> to vector<4x222xf32>
    %cst_86 = arith.constant dense<0.000000e+00> : vector<16x222xf32>
    %83 = tpu.matmul %80, %82, %cst_86 {dimension_numbers = #tpu.dot_dimension_numbers<[1], [0], [0], [1], [0, 0, 1, 1], [], []>} : vector<16x4xf32>, vector<4x222xf32>, vector<16x222xf32> -> vector<16x222xf32>
    %84 = arith.addf %78, %83 : vector<16x222xf32>
    %c7 = arith.constant 7 : index
    %c0_87 = arith.constant 0 : index
    %c0_88 = arith.constant 0 : index
    %85 = vector.load %arg3[%c7, %c0_87, %c0_88] : memref<9x16x4xf32, #tpu.memory_space<vmem>>, vector<1x16x4xf32>
    %86 = vector.shape_cast %85 : vector<1x16x4xf32> to vector<16x4xf32>
    %c0_89 = arith.constant 0 : index
    %c0_90 = arith.constant 0 : index
    %c33 = arith.constant 33 : index
    %87 = vector.load %arg1[%c0_89, %c0_90, %c33] : memref<1x4x256xf32, #tpu.memory_space<vmem>>, vector<1x4x222xf32>
    %88 = vector.shape_cast %87 : vector<1x4x222xf32> to vector<4x222xf32>
    %cst_91 = arith.constant dense<0.000000e+00> : vector<16x222xf32>
    %89 = tpu.matmul %86, %88, %cst_91 {dimension_numbers = #tpu.dot_dimension_numbers<[1], [0], [0], [1], [0, 0, 1, 1], [], []>} : vector<16x4xf32>, vector<4x222xf32>, vector<16x222xf32> -> vector<16x222xf32>
    %90 = arith.addf %84, %89 : vector<16x222xf32>
    %c7_92 = arith.constant 7 : index
    %c0_93 = arith.constant 0 : index
    %c0_94 = arith.constant 0 : index
    %91 = vector.load %arg4[%c7_92, %c0_93, %c0_94] : memref<9x16x4xf32, #tpu.memory_space<vmem>>, vector<1x16x4xf32>
    %92 = vector.shape_cast %91 : vector<1x16x4xf32> to vector<16x4xf32>
    %c0_95 = arith.constant 0 : index
    %c0_96 = arith.constant 0 : index
    %c33_97 = arith.constant 33 : index
    %93 = vector.load %arg2[%c0_95, %c0_96, %c33_97] : memref<1x4x256xf32, #tpu.memory_space<vmem>>, vector<1x4x222xf32>
    %94 = vector.shape_cast %93 : vector<1x4x222xf32> to vector<4x222xf32>
    %cst_98 = arith.constant dense<0.000000e+00> : vector<16x222xf32>
    %95 = tpu.matmul %92, %94, %cst_98 {dimension_numbers = #tpu.dot_dimension_numbers<[1], [0], [0], [1], [0, 0, 1, 1], [], []>} : vector<16x4xf32>, vector<4x222xf32>, vector<16x222xf32> -> vector<16x222xf32>
    %96 = arith.addf %90, %95 : vector<16x222xf32>
    %c8 = arith.constant 8 : index
    %c0_99 = arith.constant 0 : index
    %c0_100 = arith.constant 0 : index
    %97 = vector.load %arg3[%c8, %c0_99, %c0_100] : memref<9x16x4xf32, #tpu.memory_space<vmem>>, vector<1x16x4xf32>
    %98 = vector.shape_cast %97 : vector<1x16x4xf32> to vector<16x4xf32>
    %c0_101 = arith.constant 0 : index
    %c0_102 = arith.constant 0 : index
    %c34 = arith.constant 34 : index
    %99 = vector.load %arg1[%c0_101, %c0_102, %c34] : memref<1x4x256xf32, #tpu.memory_space<vmem>>, vector<1x4x222xf32>
    %100 = vector.shape_cast %99 : vector<1x4x222xf32> to vector<4x222xf32>
    %cst_103 = arith.constant dense<0.000000e+00> : vector<16x222xf32>
    %101 = tpu.matmul %98, %100, %cst_103 {dimension_numbers = #tpu.dot_dimension_numbers<[1], [0], [0], [1], [0, 0, 1, 1], [], []>} : vector<16x4xf32>, vector<4x222xf32>, vector<16x222xf32> -> vector<16x222xf32>
    %102 = arith.addf %96, %101 : vector<16x222xf32>
    %c8_104 = arith.constant 8 : index
    %c0_105 = arith.constant 0 : index
    %c0_106 = arith.constant 0 : index
    %103 = vector.load %arg4[%c8_104, %c0_105, %c0_106] : memref<9x16x4xf32, #tpu.memory_space<vmem>>, vector<1x16x4xf32>
    %104 = vector.shape_cast %103 : vector<1x16x4xf32> to vector<16x4xf32>
    %c0_107 = arith.constant 0 : index
    %c0_108 = arith.constant 0 : index
    %c34_109 = arith.constant 34 : index
    %105 = vector.load %arg2[%c0_107, %c0_108, %c34_109] : memref<1x4x256xf32, #tpu.memory_space<vmem>>, vector<1x4x222xf32>
    %106 = vector.shape_cast %105 : vector<1x4x222xf32> to vector<4x222xf32>
    %cst_110 = arith.constant dense<0.000000e+00> : vector<16x222xf32>
    %107 = tpu.matmul %104, %106, %cst_110 {dimension_numbers = #tpu.dot_dimension_numbers<[1], [0], [0], [1], [0, 0, 1, 1], [], []>} : vector<16x4xf32>, vector<4x222xf32>, vector<16x222xf32> -> vector<16x222xf32>
    %108 = arith.addf %102, %107 : vector<16x222xf32>
    %c0_111 = arith.constant 0 : index
    %c0_112 = arith.constant 0 : index
    %109 = vector.load %arg5[%c0_111, %c0_112] : memref<16x1xf32, #tpu.memory_space<vmem>>, vector<16x1xf32>
    %110 = vector.broadcast %109 : vector<16x1xf32> to vector<16x222xf32>
    %111 = arith.addf %108, %110 : vector<16x222xf32>
    %112 = vector.extract_strided_slice %111 {offsets = [0, 0], sizes = [8, 222], strides = [1, 1]} : vector<16x222xf32> to vector<8x222xf32>
    %c0_113 = arith.constant 0 : index
    %c0_114 = arith.constant 0 : index
    %c0_115 = arith.constant 0 : index
    %113 = vector.load %arg6[%c0_113, %c0_114, %c0_115] : memref<1x8x222xf32, #tpu.memory_space<vmem>>, vector<1x8x222xf32>
    %114 = vector.shape_cast %113 : vector<1x8x222xf32> to vector<8x222xf32>
    %115 = vector.shape_cast %112 : vector<8x222xf32> to vector<1x8x222xf32>
    tpu.vector_store %arg6[%c0_113, %c0_114, %c0_115], %115 {strides = array<i32>} : memref<1x8x222xf32, #tpu.memory_space<vmem>>, vector<1x8x222xf32>,
    %116 = vector.extract_strided_slice %111 {offsets = [8, 0], sizes = [8, 222], strides = [1, 1]} : vector<16x222xf32> to vector<8x222xf32>
    %c0_116 = arith.constant 0 : index
    %c0_117 = arith.constant 0 : index
    %c0_118 = arith.constant 0 : index
    %117 = vector.load %arg7[%c0_116, %c0_117, %c0_118] : memref<1x8x222xf32, #tpu.memory_space<vmem>>, vector<1x8x222xf32>
    %118 = vector.shape_cast %117 : vector<1x8x222xf32> to vector<8x222xf32>
    %119 = vector.shape_cast %116 : vector<8x222xf32> to vector<1x8x222xf32>
    tpu.vector_store %arg7[%c0_116, %c0_117, %c0_118], %119 {strides = array<i32>} : memref<1x8x222xf32, #tpu.memory_space<vmem>>, vector<1x8x222xf32>,
    return
  }
  func.func @transform_0(%arg0: i32) -> (i32, i32, i32) {
    %c0_i32 = arith.constant 0 : i32
    %c0_i32_0 = arith.constant 0 : i32
    %c0_i32_1 = arith.constant 0 : i32
    return %arg0, %c0_i32, %c0_i32_0 : i32, i32, i32
  }
  func.func @transform_1(%arg0: i32) -> (i32, i32, i32) {
    %c0_i32 = arith.constant 0 : i32
    %c0_i32_0 = arith.constant 0 : i32
    %c0_i32_1 = arith.constant 0 : i32
    return %arg0, %c0_i32, %c0_i32_0 : i32, i32, i32
  }
  func.func @transform_2(%arg0: i32) -> (i32, i32, i32) {
    %c0_i32 = arith.constant 0 : i32
    %c0_i32_0 = arith.constant 0 : i32
    %c0_i32_1 = arith.constant 0 : i32
    %c0_i32_2 = arith.constant 0 : i32
    return %c0_i32, %c0_i32_0, %c0_i32_1 : i32, i32, i32
  }
  func.func @transform_3(%arg0: i32) -> (i32, i32, i32) {
    %c0_i32 = arith.constant 0 : i32
    %c0_i32_0 = arith.constant 0 : i32
    %c0_i32_1 = arith.constant 0 : i32
    %c0_i32_2 = arith.constant 0 : i32
    return %c0_i32, %c0_i32_0, %c0_i32_1 : i32, i32, i32
  }
  func.func @transform_4(%arg0: i32) -> (i32, i32) {
    %c0_i32 = arith.constant 0 : i32
    %c0_i32_0 = arith.constant 0 : i32
    %c0_i32_1 = arith.constant 0 : i32
    return %c0_i32, %c0_i32_0 : i32, i32
  }
  func.func @transform_5(%arg0: i32) -> (i32, i32, i32) {
    %c0_i32 = arith.constant 0 : i32
    %c0_i32_0 = arith.constant 0 : i32
    %c0_i32_1 = arith.constant 0 : i32
    return %arg0, %c0_i32, %c0_i32_0 : i32, i32, i32
  }
  func.func @transform_6(%arg0: i32) -> (i32, i32, i32) {
    %c0_i32 = arith.constant 0 : i32
    %c0_i32_0 = arith.constant 0 : i32
    %c0_i32_1 = arith.constant 0 : i32
    return %arg0, %c0_i32, %c0_i32_0 : i32, i32, i32
  }
}

</mosaic_0001>

<bundles_post_ra>
// kernel: neg.1
= control target key start
LH: loop header
LB: loop body
LE: loop exit
PB: predicated region body
PF: predicated region fallthrough
CT: control target
= control target key end

     0   :  { %s152_s0 = inlined_call_operand.vmem [shape: f32[8,4,3,3], index: 0, kind: input, shape index: {}]   ;;  %s153_s1 = inlined_call_operand.vmem [shape: f32[8,4,3,3], index: 1, kind: output, shape index: {}]  }
   0x1   :  { %v2_v0 = vld [vmem:[%s152_s0] sm:$0xf]  ;;  %v72_v1 = vld [vmem:[%s152_s0 + $0xc] sm:$0xf]  ;;  %v74_v2 = vld [vmem:[%s152_s0 + $0x18] sm:$0xf] }
   0x2   :  { %v5_v3 = vxor.u32 2147483648, %v2_v0  ;;  %v12_v4 = vxor.u32 2147483648, %v72_v1  ;;  %v20_v5 = vxor.u32 2147483648, %v74_v2  ;;  %v76_v6 = vld [vmem:[%s152_s0 + $0x4] sm:$0xf] }
   0x3   :  { %v28_v7 = vxor.u32 2147483648, %v76_v6  ;;  %v78_v8 = vld [vmem:[%s152_s0 + $0x10] sm:$0xf]  ;;  %v80_v9 = vld [vmem:[%s152_s0 + $0x1c] sm:$0xf] }
   0x4   :  { %7 = vst [vmem:[%s153_s1] sm:$0xf] %v5_v3  ;;  %73 = vst [vmem:[%s153_s1 + $0xc] sm:$0xf] %v12_v4  ;;  %v36_v10 = vxor.u32 2147483648, %v78_v8  ;;  %v44_v11 = vxor.u32 2147483648, %v80_v9 }
   0x5   :  { %75 = vst [vmem:[%s153_s1 + $0x18] sm:$0xf] %v20_v5  ;;  %v82_v12 = vld [vmem:[%s152_s0 + $0x8] sm:$0xf]  ;;  %v84_v13 = vld [vmem:[%s152_s0 + $0x14] sm:$0xf] }
   0x6   :  { %77 = vst [vmem:[%s153_s1 + $0x4] sm:$0xf] %v28_v7  ;;  %v52_v14 = vxor.u32 2147483648, %v82_v12  ;;  %v60_v15 = vxor.u32 2147483648, %v84_v13  ;;  %v86_v16 = vld [vmem:[%s152_s0 + $0x20] sm:$0xf] }
   0x7   :  { %79 = vst [vmem:[%s153_s1 + $0x10] sm:$0xf] %v36_v10  ;;  %81 = vst [vmem:[%s153_s1 + $0x1c] sm:$0xf] %v44_v11  ;;  %v68_v17 = vxor.u32 2147483648, %v86_v16 }
   0x8   :  { %83 = vst [vmem:[%s153_s1 + $0x8] sm:$0xf] %v52_v14  ;;  %85 = vst [vmem:[%s153_s1 + $0x14] sm:$0xf] %v60_v15 }
   0x9   :  { %87 = vst [vmem:[%s153_s1 + $0x20] sm:$0xf] %v68_v17 }

// kernel: complex_conv2d.1
= control target key start
LH: loop header
LB: loop body
LE: loop exit
PB: predicated region body
PF: predicated region fallthrough
CT: control target
= control target key end

     0   :  { %s2497_s21 = smov 0   ;;  %s2768_s0 = inlined_call_operand.vmem [shape: f32[2,4,256], index: 0, kind: input, shape index: {}]   ;;  %s2769_s1 = inlined_call_operand.vmem [shape: f32[2,4,256], index: 1, kind: input, shape index: {}]   ;;  %s2770_s2 = inlined_call_operand.vmem [shape: f32[9,16,4], index: 2, kind: input, shape index: {}]   ;;  %s2771_s3 = inlined_call_operand.vmem [shape: f32[9,16,4], index: 3, kind: input, shape index: {}]   ;;  %s2772_s4 = inlined_call_operand.vmem [shape: f32[16,1], index: 4, kind: input, shape index: {}]   ;;  %s2773_s5 = inlined_call_operand.vmem [shape: f32[2,8,222], index: 5, kind: output, shape index: {0}]   ;;  %s2774_s6 = inlined_call_operand.vmem [shape: f32[2,8,222], index: 6, kind: output, shape index: {1}]  }
   0x1 LB: > { %s2231_s22 = sadd.s32 4294967295, %s2450_s21   ;;  %p2235_p0 = scmp.ge.s32.totalorder %s2450_s21, 1  ;;  %s2450_s21 = sphi %s2497_s21, %s17_s21  }
   0x2   : > { %p225_p1 = scmp.lt.s32.totalorder %s2450_s21, 3 }
   0x4   : > { %p226_p2 = pnand %p2235_p0, %p225_p1 }
   0x5   : > { %p265_p3 = scmp.lt.s32.totalorder (!%p226_p2), %s2231_s22, 1  ;;  %v2452_v0 = vmov (!%p226_p2), 0.0   ;;  %vm300_vm0 = vcmask (!%p226_p2), 1043456   ;;  %s2453_s30 = smov (!%p226_p2), 111   ;;  %v288_v5 = vld [vmem:[%s2771_s3] sm:$0xff] (!%p226_p2)  ;;  %vm293_vm1 = vcmask (!%p226_p2), 31744  }
   0x6   : > { %229 = sbr.rel (%p226_p2) target bundleno = 424 (0x1a8), region = 40  ;;  %369 = vmatprep.mubr.f32.mxu1 (!%p226_p2), %v2452_v0  ;;  %1274 = vmatprep.mubr.f32.mxu0 (!%p226_p2), %v2452_v0  ;;  %s2454_s7 = smov (!%p226_p2), 110   ;;  %v289_v6 = vld [vmem:[%s2771_s3 + $0x8] sm:$0xff] (!%p226_p2)  ;;  %v285_v7 = vld [vmem:[%s2770_s2] sm:$0xff] (!%p226_p2)  ;;  %v2461_v11 = vmov (!%p226_p2), 0   ;;  %vm1301_vm2 = vcmask (!%p226_p2), 900096  }
   0x7   : > { %s2455_s12 = smov (!%p226_p2), 127   ;;  %v286_v8 = vld [vmem:[%s2770_s2 + $0x8] sm:$0xff] (!%p226_p2)  ;;  %s2456_s17 = smov (!%p226_p2), 96   ;;  %v2111_v9 = vld [vmem:[%s2772_s4] sm:$0xff] (!%p226_p2)  ;;  %2440 = vset.pattern.permute.xlu0 (!%p226_p2), %v2461_v11  ;;  %2441 = vset.pattern.permute.xlu1 (!%p226_p2), %v2461_v11  ;;  %vm1096_vm3 = vcmask (!%p226_p2), 908288   ;;  %vm481_vm4 = vcmask (!%p226_p2), 1039360  }
   0x8   : > { %s2457_s18 = smov (!%p226_p2), 126   ;;  %s2458_s19 = smov (!%p226_p2), 95   ;;  %v2112_v10 = vld [vmem:[%s2772_s4 + $0x8] sm:$0xff] (!%p226_p2)  ;;  %v2294_v16 = vld [vmem:[%s2771_s3 + $0x40] sm:$0xff] (!%p226_p2)  ;;  %v2252_v21 = vld [vmem:[%s2770_s2 + $0x10] sm:$0xff] (!%p226_p2)  ;;  %vm1506_vm5 = vcmask (!%p226_p2), 785408  }
   0x9   : > { %s2459_s20 = smov (!%p226_p2), 112   ;;  %v2295_v22 = vld [vmem:[%s2771_s3 + $0x48] sm:$0xff] (!%p226_p2)  ;;  %v2253_v26 = vld [vmem:[%s2770_s2 + $0x18] sm:$0xff] (!%p226_p2)  ;;  %v2300_v27 = vld [vmem:[%s2770_s2 + $0x50] sm:$0xff] (!%p226_p2)  ;;  %vm686_vm6 = vcmask (!%p226_p2), 1031168   ;;  %vm1711_vm7 = vcmask (!%p226_p2), 777216  }
   0xa   : > { %v2258_v31 = vld [vmem:[%s2771_s3 + $0x10] sm:$0xff] (!%p226_p2)  ;;  %v2301_v32 = vld [vmem:[%s2770_s2 + $0x58] sm:$0xff] (!%p226_p2)  ;;  %v2264_v41 = vld [vmem:[%s2770_s2 + $0x20] sm:$0xff] (!%p226_p2)  ;;  %vm891_vm8 = vcmask (!%p226_p2), 916480   ;;  %vm1916_vm9 = vcmask (!%p226_p2), 769024  }
   0xb   : > { %v2259_v36 = vld [vmem:[%s2771_s3 + $0x18] sm:$0xff] (!%p226_p2)  ;;  %v2306_v37 = vld [vmem:[%s2771_s3 + $0x50] sm:$0xff] (!%p226_p2)  ;;  %v2265_v46 = vld [vmem:[%s2770_s2 + $0x28] sm:$0xff] (!%p226_p2) }
   0xc   : > { %v2307_v42 = vld [vmem:[%s2771_s3 + $0x58] sm:$0xff] (!%p226_p2)  ;;  %v2312_v47 = vld [vmem:[%s2770_s2 + $0x60] sm:$0xff] (!%p226_p2)  ;;  %v2313_v52 = vld [vmem:[%s2770_s2 + $0x68] sm:$0xff] (!%p226_p2) }
   0xd   : > { %s2776_s22 = smov (!%p265_p3, %s2231_s22), 1  ;;  %v2270_v51 = vld [vmem:[%s2771_s3 + $0x20] sm:$0xff]  ;;  %v2271_v56 = vld [vmem:[%s2771_s3 + $0x28] sm:$0xff]  ;;  %v2276_v61 = vld [vmem:[%s2770_s2 + $0x30] sm:$0xff] }
   0xe   : > { %s2350_s23 = sshll.u32 %s2776_s22, 3  ;;  %v2318_v57 = vld [vmem:[%s2771_s3 + $0x60] sm:$0xff]  ;;  %v2319_v62 = vld [vmem:[%s2771_s3 + $0x68] sm:$0xff] }
   0xf   : > { %s274_s26 = scalar_lea.vmem %s2769_s1, %s2350_s23  ;;  %s269_s29 = scalar_lea.vmem %s2768_s0, %s2350_s23 }
  0x10   : > { %v1192_v1 = vld [vmem:[%s274_s26] sm:$0xff]  ;;  %s2460_s23 = smov 94   ;;  %s2352_s26 = sshll.u32 %s2776_s22, 4 }
  0x11   : > { %v1294_v2 = vld [vmem:[%s269_s29] sm:$0xff]  ;;  %1195 = vrot.lane.b32.xlu0 %v1192_v1, %s2453_s30  ;;  %v1194_v3 = vcombine.high %v1192_v1, %v1192_v1  ;;  %s279_s29 = scalar_lea.vmem %s2773_s5, %s2352_s26 }
  0x12   : > { %1297 = vrot.lane.b32.xlu1 %v1294_v2, %s2454_s7  ;;  %v1296_v4 = vcombine.high %v1294_v2, %v1294_v2 }
  0x13   : > { %2244 = vmatprep.subr.msk.mxu1 %vm300_vm0, %v1194_v3 }
  0x14   : > { %2245 = vmatpush1.msk.msra.mxu1 %vm300_vm0, %v1192_v1 }
  0x15   : > { %1197 = vrot.lane.b32.xlu0 %v1194_v3, %s2453_s30  ;;  %2246 = vmatmul.mubr.msk.f32.vlgmr.msra.gmra.mrb[0].mxu1 %vm293_vm1, %v288_v5 }
  0x16   : > { %1299 = vrot.lane.b32.xlu1 %v1296_v4, %s2454_s7  ;;  %2248 = vmatprep.subr.msk.mxu1 %vm300_vm0, %v1296_v4 }
  0x17   : > { %375 = vmatprep.mubr.f32.mxu1 %v2452_v0  ;;  %2249 = vmatpush1.msk.msra.mxu1 %vm300_vm0, %v1294_v2 }
  0x19   : > { %477 = vrot.lane.b32.xlu0 %v1294_v2, %s2455_s12  ;;  %2247 = vmatmul.mubr.msk.f32.gmra.mrb[2].mxu1 %vm293_vm1, %v289_v6 }
  0x1a   : > { %479 = vrot.lane.b32.xlu1 %v1296_v4, %s2455_s12  ;;  %458 = vmatprep.mubr.f32.mxu1 %v2452_v0 }
  0x1d   : > { %1400 = vrot.lane.b32.xlu0 %v1192_v1, %s2454_s7  ;;  %2250 = vmatmul.mubr.msk.f32.vlgmr.msra.gmra.mrb[0].mxu1 %vm293_vm1, %v285_v7 }
  0x1e   : > { %1402 = vrot.lane.b32.xlu1 %v1194_v3, %s2454_s7  ;;  %464 = vmatprep.mubr.f32.mxu1 %v2452_v0  ;;  %s284_s7 = scalar_lea.vmem %s2774_s6, %s2352_s26 }
  0x21   : > { %580 = vrot.lane.b32.xlu0 %v1192_v1, %s2455_s12  ;;  %2251 = vmatmul.mubr.msk.f32.gmra.mrb[2].mxu1 %vm293_vm1, %v286_v8  ;;  %v2282_v8 = vld [vmem:[%s2771_s3 + $0x30] sm:$0xff] }
  0x22   : > { %582 = vrot.lane.b32.xlu1 %v1194_v3, %s2455_s12  ;;  %557 = vmatprep.mubr.f32.mxu1 %v2452_v0 }
  0x25   : > { %1502 = vrot.lane.b32.xlu0 %v1294_v2, %s2456_s17 }
  0x26   : > { %1504 = vrot.lane.b32.xlu1 %v1296_v4, %s2456_s17 }
  0x29   : > { %682 = vrot.lane.b32.xlu0 %v1294_v2, %s2457_s18 }
  0x2a   : > { %684 = vrot.lane.b32.xlu1 %v1296_v4, %s2457_s18 }
  0x2d   : > { %1605 = vrot.lane.b32.xlu0 %v1192_v1, %s2456_s17 }
  0x2e   : > { %1607 = vrot.lane.b32.xlu1 %v1194_v3, %s2456_s17 }
  0x31   : > { %785 = vrot.lane.b32.xlu0 %v1192_v1, %s2457_s18 }
  0x32   : > { %787 = vrot.lane.b32.xlu1 %v1194_v3, %s2457_s18 }
  0x35   : > { %1707 = vrot.lane.b32.xlu0 %v1294_v2, %s2458_s19 }
  0x36   : > { %1709 = vrot.lane.b32.xlu1 %v1296_v4, %s2458_s19 }
  0x39   : > { %887 = vrot.lane.b32.xlu0 %v1294_v2, %s2459_s20 }
  0x3a   : > { %889 = vrot.lane.b32.xlu1 %v1296_v4, %s2459_s20 }
  0x3d   : > { %1810 = vrot.lane.b32.xlu0 %v1192_v1, %s2458_s19 }
  0x3e   : > { %1812 = vrot.lane.b32.xlu1 %v1194_v3, %s2458_s19 }
  0x41   : > { %990 = vrot.lane.b32.xlu0 %v1192_v1, %s2459_s20 }
  0x42   : > { %992 = vrot.lane.b32.xlu1 %v1194_v3, %s2459_s20 }
  0x45   : > { %1912 = vrot.lane.b32.xlu0 %v1294_v2, %s2460_s23 }
  0x46   : > { %1914 = vrot.lane.b32.xlu1 %v1296_v4, %s2460_s23 }
  0x49   : > { %1092 = vrot.lane.b32.xlu0 %v1294_v2, %s2453_s30 }
  0x4a   : > { %1094 = vrot.lane.b32.xlu1 %v1296_v4, %s2453_s30  ;;  %v2324_v4 = vld [vmem:[%s2770_s2 + $0x70] sm:$0xff] }
  0x4d   : > { %2015 = vrot.lane.b32.xlu0 %v1192_v1, %s2460_s23 }
  0x4e   : > { %2017 = vrot.lane.b32.xlu1 %v1194_v3, %s2460_s23  ;;  %v2277_v3 = vld [vmem:[%s2770_s2 + $0x38] sm:$0xff] }
  0x51   : > { %2115 = vperm.xlu0 %2440, %v2111_v9   ;;  %v2325_v9 = vld [vmem:[%s2770_s2 + $0x78] sm:$0xff] }
  0x52   : > { %2120 = vperm.xlu1 %2441, %v2112_v10  }
  0x83   : > { %v1196_v12 = vpop.permute.xlu0 %1195 }
  0x84   : > { %v1298_v13 = vpop.permute.xlu1 %1297 }
  0x87   : > { %v1198_v14 = vpop.permute.xlu0 %1197 }
  0x88   : > { %v1300_v15 = vpop.permute.xlu1 %1299  ;;  %2296 = vmatprep.subr.msk.mxu0 %vm300_vm0, %v1198_v14  ;;  %v1199_v18 = vsel %vm1096_vm3, %v1196_v12, %v1198_v14  ;;  %v2330_v14 = vld [vmem:[%s2771_s3 + $0x70] sm:$0xff] }
  0x89   : > { %v1302_v17 = vsel %vm1301_vm2, %v1298_v13, %v1300_v15  ;;  %2297 = vmatpush1.msk.msra.mxu0 %vm300_vm0, %v1199_v18  ;;  %v2283_v13 = vld [vmem:[%s2771_s3 + $0x38] sm:$0xff]  ;;  %v2288_v18 = vld [vmem:[%s2770_s2 + $0x40] sm:$0xff] }
  0x8a   : > { %2298 = vmatmul.mubr.msk.f32.vlgmr.msra.gmra.mrb[0].mxu0 %vm293_vm1, %v2294_v16  ;;  %2302 = vmatprep.subr.msk.mxu0 %vm300_vm0, %v1300_v15 }
  0x8b   : > { %2303 = vmatpush1.msk.msra.mxu0 %vm300_vm0, %v1302_v17  ;;  %v478_v19 = vpop.permute.xlu0 %477  ;;  %1280 = vmatprep.mubr.f32.mxu0 %v2452_v0 }
  0x8c   : > { %v480_v20 = vpop.permute.xlu1 %479 }
  0x8d   : > { %v482_v23 = vsel %vm481_vm4, %v478_v19, %v480_v20  ;;  %2254 = vmatprep.subr.msk.mxu1 %vm300_vm0, %v480_v20  ;;  %v2331_v19 = vld [vmem:[%s2771_s3 + $0x78] sm:$0xff] }
  0x8e   : > { %2255 = vmatpush1.msk.msra.mxu1 %vm300_vm0, %v482_v23  ;;  %2299 = vmatmul.mubr.msk.f32.gmra.mrb[2].mxu0 %vm293_vm1, %v2295_v22  ;;  %v2289_v23 = vld [vmem:[%s2770_s2 + $0x48] sm:$0xff] }
  0x8f   : > { %2256 = vmatmul.mubr.msk.f32.vlgmr.msra.gmra.mrb[0].mxu1 %vm293_vm1, %v2252_v21  ;;  %v1401_v24 = vpop.permute.xlu0 %1400  ;;  %1377 = vmatprep.mubr.f32.mxu0 %v2452_v0 }
  0x90   : > { %v1403_v25 = vpop.permute.xlu1 %1402  ;;  %563 = vmatprep.mubr.f32.mxu1 %v2452_v0 }
  0x91   : > { %v1404_v28 = vsel %vm1301_vm2, %v1401_v24, %v1403_v25  ;;  %2308 = vmatprep.subr.msk.mxu0 %vm300_vm0, %v1403_v25  ;;  %v2336_v24 = vld [vmem:[%s2770_s2 + $0x80] sm:$0xff] }
  0x92   : > { %2304 = vmatmul.mubr.msk.f32.vlgmr.msra.gmra.mrb[0].mxu0 %vm293_vm1, %v2300_v27  ;;  %v2342_v27 = vld [vmem:[%s2771_s3 + $0x80] sm:$0xff] }
  0x93   : > { %2257 = vmatmul.mubr.msk.f32.gmra.mrb[2].mxu1 %vm293_vm1, %v2253_v26  ;;  %v581_v29 = vpop.permute.xlu0 %580  ;;  %2309 = vmatpush1.msk.msra.mxu0 %vm300_vm0, %v1404_v28  ;;  %v2337_v26 = vld [vmem:[%s2770_s2 + $0x88] sm:$0xff] }
  0x94   : > { %v583_v30 = vpop.permute.xlu1 %582  ;;  %659 = vmatprep.mubr.f32.mxu1 %v2452_v0  ;;  %1383 = vmatprep.mubr.f32.mxu0 %v2452_v0  ;;  %v2343_v28 = vld [vmem:[%s2771_s3 + $0x88] sm:$0xff] }
  0x95   : > { %v584_v33 = vsel %vm481_vm4, %v581_v29, %v583_v30  ;;  %2260 = vmatprep.subr.msk.mxu1 %vm300_vm0, %v583_v30 }
  0x96   : > { %2261 = vmatpush1.msk.msra.mxu1 %vm300_vm0, %v584_v33  ;;  %2305 = vmatmul.mubr.msk.f32.gmra.mrb[2].mxu0 %vm293_vm1, %v2301_v32 }
  0x97   : > { %2262 = vmatmul.mubr.msk.f32.vlgmr.msra.gmra.mrb[0].mxu1 %vm293_vm1, %v2258_v31  ;;  %v1503_v34 = vpop.permute.xlu0 %1502  ;;  %1479 = vmatprep.mubr.f32.mxu0 %v2452_v0 }
  0x98   : > { %v1505_v35 = vpop.permute.xlu1 %1504  ;;  %665 = vmatprep.mubr.f32.mxu1 %v2452_v0 }
  0x99   : > { %v1507_v38 = vsel %vm1506_vm5, %v1503_v34, %v1505_v35  ;;  %2314 = vmatprep.subr.msk.mxu0 %vm300_vm0, %v1505_v35 }
  0x9a   : > { %2310 = vmatmul.mubr.msk.f32.vlgmr.msra.gmra.mrb[0].mxu0 %vm293_vm1, %v2306_v37 }
  0x9b   : > { %2263 = vmatmul.mubr.msk.f32.gmra.mrb[2].mxu1 %vm293_vm1, %v2259_v36  ;;  %v683_v39 = vpop.permute.xlu0 %682  ;;  %2315 = vmatpush1.msk.msra.mxu0 %vm300_vm0, %v1507_v38 }
  0x9c   : > { %v685_v40 = vpop.permute.xlu1 %684  ;;  %762 = vmatprep.mubr.f32.mxu1 %v2452_v0  ;;  %1485 = vmatprep.mubr.f32.mxu0 %v2452_v0 }
  0x9d   : > { %v687_v43 = vsel %vm686_vm6, %v683_v39, %v685_v40  ;;  %2266 = vmatprep.subr.msk.mxu1 %vm300_vm0, %v685_v40 }
  0x9e   : > { %2267 = vmatpush1.msk.msra.mxu1 %vm300_vm0, %v687_v43  ;;  %2311 = vmatmul.mubr.msk.f32.gmra.mrb[2].mxu0 %vm293_vm1, %v2307_v42 }
  0x9f   : > { %2268 = vmatmul.mubr.msk.f32.vlgmr.msra.gmra.mrb[0].mxu1 %vm293_vm1, %v2264_v41  ;;  %v1606_v44 = vpop.permute.xlu0 %1605  ;;  %1582 = vmatprep.mubr.f32.mxu0 %v2452_v0 }
  0xa0   : > { %v1608_v45 = vpop.permute.xlu1 %1607  ;;  %768 = vmatprep.mubr.f32.mxu1 %v2452_v0 }
  0xa1   : > { %v1609_v48 = vsel %vm1506_vm5, %v1606_v44, %v1608_v45  ;;  %2320 = vmatprep.subr.msk.mxu0 %vm300_vm0, %v1608_v45 }
  0xa2   : > { %2316 = vmatmul.mubr.msk.f32.vlgmr.msra.gmra.mrb[0].mxu0 %vm293_vm1, %v2312_v47 }
  0xa3   : > { %2269 = vmatmul.mubr.msk.f32.gmra.mrb[2].mxu1 %vm293_vm1, %v2265_v46  ;;  %v786_v49 = vpop.permute.xlu0 %785  ;;  %2321 = vmatpush1.msk.msra.mxu0 %vm300_vm0, %v1609_v48 }
  0xa4   : > { %v788_v50 = vpop.permute.xlu1 %787  ;;  %864 = vmatprep.mubr.f32.mxu1 %v2452_v0  ;;  %1588 = vmatprep.mubr.f32.mxu0 %v2452_v0 }
  0xa5   : > { %v789_v53 = vsel %vm686_vm6, %v786_v49, %v788_v50  ;;  %2272 = vmatprep.subr.msk.mxu1 %vm300_vm0, %v788_v50 }
  0xa6   : > { %2273 = vmatpush1.msk.msra.mxu1 %vm300_vm0, %v789_v53  ;;  %2317 = vmatmul.mubr.msk.f32.gmra.mrb[2].mxu0 %vm293_vm1, %v2313_v52 }
  0xa7   : > { %2274 = vmatmul.mubr.msk.f32.vlgmr.msra.gmra.mrb[0].mxu1 %vm293_vm1, %v2270_v51  ;;  %v1708_v54 = vpop.permute.xlu0 %1707  ;;  %1684 = vmatprep.mubr.f32.mxu0 %v2452_v0 }
  0xa8   : > { %v1710_v55 = vpop.permute.xlu1 %1709  ;;  %870 = vmatprep.mubr.f32.mxu1 %v2452_v0 }
  0xa9   : > { %v1712_v58 = vsel %vm1711_vm7, %v1708_v54, %v1710_v55  ;;  %2326 = vmatprep.subr.msk.mxu0 %vm300_vm0, %v1710_v55 }
  0xaa   : > { %2322 = vmatmul.mubr.msk.f32.vlgmr.msra.gmra.mrb[0].mxu0 %vm293_vm1, %v2318_v57 }
  0xab   : > { %2275 = vmatmul.mubr.msk.f32.gmra.mrb[2].mxu1 %vm293_vm1, %v2271_v56  ;;  %v888_v59 = vpop.permute.xlu0 %887  ;;  %2327 = vmatpush1.msk.msra.mxu0 %vm300_vm0, %v1712_v58 }
  0xac   : > { %v890_v60 = vpop.permute.xlu1 %889  ;;  %967 = vmatprep.mubr.f32.mxu1 %v2452_v0  ;;  %1690 = vmatprep.mubr.f32.mxu0 %v2452_v0 }
  0xad   : > { %v892_v63 = vsel %vm891_vm8, %v888_v59, %v890_v60  ;;  %2278 = vmatprep.subr.msk.mxu1 %vm300_vm0, %v890_v60 }
  0xae   : > { %2279 = vmatpush1.msk.msra.mxu1 %vm300_vm0, %v892_v63  ;;  %2323 = vmatmul.mubr.msk.f32.gmra.mrb[2].mxu0 %vm293_vm1, %v2319_v62 }
  0xaf   : > { %2280 = vmatmul.mubr.msk.f32.vlgmr.msra.gmra.mrb[0].mxu1 %vm293_vm1, %v2276_v61  ;;  %v1811_v1 = vpop.permute.xlu0 %1810  ;;  %1787 = vmatprep.mubr.f32.mxu0 %v2452_v0 }
  0xb0   : > { %v1813_v2 = vpop.permute.xlu1 %1812  ;;  %973 = vmatprep.mubr.f32.mxu1 %v2452_v0 }
  0xb1   : > { %v1814_v5 = vsel %vm1711_vm7, %v1811_v1, %v1813_v2  ;;  %2332 = vmatprep.subr.msk.mxu0 %vm300_vm0, %v1813_v2 }
  0xb2   : > { %2328 = vmatmul.mubr.msk.f32.vlgmr.msra.gmra.mrb[0].mxu0 %vm293_vm1, %v2324_v4 }
  0xb3   : > { %2281 = vmatmul.mubr.msk.f32.gmra.mrb[2].mxu1 %vm293_vm1, %v2277_v3  ;;  %v991_v6 = vpop.permute.xlu0 %990  ;;  %2333 = vmatpush1.msk.msra.mxu0 %vm300_vm0, %v1814_v5 }
  0xb4   : > { %v993_v7 = vpop.permute.xlu1 %992  ;;  %1069 = vmatprep.mubr.f32.mxu1 %v2452_v0  ;;  %1793 = vmatprep.mubr.f32.mxu0 %v2452_v0 }
  0xb5   : > { %v994_v10 = vsel %vm891_vm8, %v991_v6, %v993_v7  ;;  %2284 = vmatprep.subr.msk.mxu1 %vm300_vm0, %v993_v7 }
  0xb6   : > { %2285 = vmatpush1.msk.msra.mxu1 %vm300_vm0, %v994_v10  ;;  %2329 = vmatmul.mubr.msk.f32.gmra.mrb[2].mxu0 %vm293_vm1, %v2325_v9 }
  0xb7   : > { %2286 = vmatmul.mubr.msk.f32.vlgmr.msra.gmra.mrb[0].mxu1 %vm293_vm1, %v2282_v8  ;;  %v1913_v11 = vpop.permute.xlu0 %1912  ;;  %1889 = vmatprep.mubr.f32.mxu0 %v2452_v0 }
  0xb8   : > { %v1915_v12 = vpop.permute.xlu1 %1914  ;;  %1075 = vmatprep.mubr.f32.mxu1 %v2452_v0 }
  0xb9   : > { %v1917_v15 = vsel %vm1916_vm9, %v1913_v11, %v1915_v12  ;;  %2338 = vmatprep.subr.msk.mxu0 %vm300_vm0, %v1915_v12 }
  0xba   : > { %2334 = vmatmul.mubr.msk.f32.vlgmr.msra.gmra.mrb[0].mxu0 %vm293_vm1, %v2330_v14 }
  0xbb   : > { %2287 = vmatmul.mubr.msk.f32.gmra.mrb[2].mxu1 %vm293_vm1, %v2283_v13  ;;  %v1093_v16 = vpop.permute.xlu0 %1092  ;;  %2339 = vmatpush1.msk.msra.mxu0 %vm300_vm0, %v1917_v15 }
  0xbc   : > { %v1095_v17 = vpop.permute.xlu1 %1094  ;;  %1172 = vmatprep.mubr.f32.mxu1 %v2452_v0  ;;  %1895 = vmatprep.mubr.f32.mxu0 %v2452_v0 }
  0xbd   : > { %v1097_v20 = vsel %vm1096_vm3, %v1093_v16, %v1095_v17  ;;  %2290 = vmatprep.subr.msk.mxu1 %vm300_vm0, %v1095_v17 }
  0xbe   : > { %2291 = vmatpush1.msk.msra.mxu1 %vm300_vm0, %v1097_v20  ;;  %2335 = vmatmul.mubr.msk.f32.gmra.mrb[2].mxu0 %vm293_vm1, %v2331_v19 }
  0xbf   : > { %2292 = vmatmul.mubr.msk.f32.vlgmr.msra.gmra.mrb[0].mxu1 %vm293_vm1, %v2288_v18  ;;  %v2016_v21 = vpop.permute.xlu0 %2015  ;;  %1992 = vmatprep.mubr.f32.mxu0 %v2452_v0 }
  0xc0   : > { %v2018_v22 = vpop.permute.xlu1 %2017  ;;  %1178 = vmatprep.mubr.f32.mxu1 %v2452_v0 }
  0xc1   : > { %v2019_v25 = vsel %vm1916_vm9, %v2016_v21, %v2018_v22  ;;  %2344 = vmatprep.subr.msk.mxu0 %vm300_vm0, %v2018_v22 }
  0xc2   : > { %2340 = vmatmul.mubr.msk.f32.vlgmr.msra.gmra.mrb[0].mxu0 %vm293_vm1, %v2336_v24 }
  0xc3   : > { %2293 = vmatmul.mubr.msk.f32.gmra.mrb[2].mxu1 %vm293_vm1, %v2289_v23  ;;  %2345 = vmatpush1.msk.msra.mxu0 %vm300_vm0, %v2019_v25 }
  0xc4   : > { %1998 = vmatprep.mubr.f32.mxu0 %v2452_v0 }
  0xc6   : > { %2341 = vmatmul.mubr.msk.f32.gmra.mrb[2].mxu0 %vm293_vm1, %v2337_v26 }
  0xc7   : > { %2094 = vmatprep.mubr.f32.mxu0 %v2452_v0 }
  0xca   : > { %2346 = vmatmul.mubr.msk.f32.vlgmr.msra.gmra.mrb[0].mxu0 %vm293_vm1, %v2342_v27 }
  0xcb   : > { %2100 = vmatprep.mubr.f32.mxu0 %v2452_v0 }
  0xce   : > { %2347 = vmatmul.mubr.msk.f32.gmra.mrb[2].mxu0 %vm293_vm1, %v2343_v28 }
  0xd0   : > { %v2116_v34 = vpop.permute.xlu0 %2115 }
  0xd1   : > { %v2121_v40 = vpop.permute.xlu1 %2120 }
 0x192   : > { %v1174_v29 = vpop.f32.mrb[0].mxu1 }
 0x193   : > { %v1176_v30 = vpop.f32.mrb[1].mxu1 }
 0x196   : > { %v1180_v31 = vpop.f32.mrb[2].mxu1 }
 0x197   : > { %v1182_v32 = vpop.f32.mrb[3].mxu1 }
 0x19d   : > { %v2096_v33 = vpop.f32.mrb[0].mxu0 }
 0x19e   : > { %v2354_v35 = vadd.f32 %v2096_v33, %v1174_v29  ;;  %v2098_v36 = vpop.f32.mrb[1].mxu0 }
 0x19f   : > { %v2355_v37 = vadd.f32 %v2098_v36, %v1176_v30 }
 0x1a0   : > { %v2123_v0 = vadd.f32 %v2354_v35, %v2116_v34 }
 0x1a1   : > { %v2124_v38 = vadd.f32 %v2355_v37, %v2116_v34  ;;  %v2102_v39 = vpop.f32.mrb[2].mxu0 }
 0x1a2   : > { %2127 = vst [vmem:[%s279_s29] sm:$0xff] %v2123_v0  ;;  %v2356_v41 = vadd.f32 %v2102_v39, %v1180_v31  ;;  %v2104_v42 = vpop.f32.mrb[3].mxu0 }
 0x1a3   : > { %2128 = vst.msk [vmem:[%s279_s29 + $0x8] sm:$0xff] %vm1916_vm9, %v2124_v38  ;;  %v2357_v43 = vadd.f32 %v2104_v42, %v1182_v32 }
 0x1a4   : > { %v2125_v44 = vadd.f32 %v2356_v41, %v2121_v40 }
 0x1a5   : > { %v2126_v45 = vadd.f32 %v2357_v43, %v2121_v40 }
 0x1a6   : > { %2129 = vst [vmem:[%s284_s7] sm:$0xff] %v2125_v44 }
 0x1a7   : > { %2130 = vst.msk [vmem:[%s284_s7 + $0x8] sm:$0xff] %vm1916_vm9, %v2126_v45 }
 0x1a8 PF: > { %s17_s21 = sadd.s32 1, %s2450_s21  }
 0x1a9   : > { %p14_p4 = scmp.ge.s32.totalorder %s17_s21, 4  }
 0x1ab   :  { %16 = sbr.rel (!%p14_p4) target bundleno = 1 (0x1), region = 101 }

</bundles_post_ra>
